<compile_context>
chip_gen: v7x
topology: tpu7x:2x2x1
jax: 0.10.0
libtpu: 0.0.40
codegen_flags: <defaults>
</compile_context>

<pallas_src>
import jax
import jax.numpy as jnp
from jax.experimental import pallas as pl
from jax.experimental.pallas import tpu as pltpu

BN_EPS = 1e-5


# ------------------------- Pallas kernel -------------------------

def _make_sta_kernel(C, WP, LP, S):
    """Fused EMSA(conv1+conv3+conv5, BN folded, ReLU) * attention + residual.

    Grid: (B, D, 5) = (batch, output depth, depth tap kd); kd is the reduction axis.
      att_ref : SMEM [B, D]          per-(b,d) attention scalar (sigmoid(sigmoid(fc(.))))
      x_ref   : VMEM [1,1,C,LP2]     one padded depth slice (bf16), positions on lanes
      w_ref   : VMEM [5,4C,25C]      fused per-kd tap weights (conv1|conv3|conv5|identity), bf16
      t_ref   : VMEM [4C,1]          fused bias (conv bias + BN, zeros for identity rows)
      o_ref   : VMEM [1,1,C,LP]      STA output on the padded spatial plane (ring discarded)
      acc_ref : VMEM scratch [4C,LP] f32 accumulator across the 5 depth taps
    """

    def kernel(att_ref, x_ref, w_ref, t_ref, o_ref, acc_ref):
        b = pl.program_id(0)
        d = pl.program_id(1)
        kd = pl.program_id(2)

        @pl.when(kd == 0)
        def _init():
            acc_ref[...] = jnp.zeros_like(acc_ref)

        xs = x_ref[0, 0]                                        # [C, LP2] bf16
        # Per-tile im2col in VMEM: 25 shifted (kh, kw) windows of the padded plane.
        wins = [xs[:, (S + (kh - 2) * WP + (kw - 2)):(S + (kh - 2) * WP + (kw - 2)) + LP]
                for kh in range(5) for kw in range(5)]
        cols = jnp.concatenate(wins, axis=0)                    # [25C, LP] bf16
        w_kd = w_ref[kd]                                        # [4C, 25C] bf16 (resident weights)
        acc_ref[...] += jnp.dot(w_kd, cols, preferred_element_type=jnp.float32)

        @pl.when(kd == 4)
        def _finalize():
            acc = acc_ref[...]                                  # [4C, LP] f32
            y = jnp.maximum(acc[0:3 * C] + t_ref[0:3 * C, :], 0.0)
            msa = y[0:C] + y[C:2 * C] + y[2 * C:3 * C]          # conv1 + conv3 + conv5 branches
            a = att_ref[b, d]                                   # SMEM scalar read
            o_ref[0, 0] = (a * msa + acc[3 * C:4 * C]).astype(o_ref.dtype)

    return kernel


# ------------------------- JAX wrapper -------------------------

def sta_forward(x, params, *, vmem_limit_bytes=None):
    """x: [B, C, D, H, W] float32 (PyTorch NCDHW). Returns the STA output, same shape."""
    B, C, D, H, W = x.shape
    DP, HP, WP = D + 4, H + 4, W + 4
    LP = HP * WP                      # padded spatial plane, flattened (lane axis)
    S = 2 * WP + 2                    # max |flat shift| of a 5x5 in-plane tap
    LP2 = LP + 2 * S
    f32 = jnp.float32

    # ---- attention scalar: SAP -> .view(-1, C) -> Linear -> Sigmoid -> Sigmoid (tiny GEMV) ----
    pooled = jnp.mean(x, axis=(3, 4))                           # [B, C, D]
    viewed = pooled.reshape(B * D, C)                           # == torch .view(-1, C) on [B,C,D,1,1]
    logit = viewed @ params['fc_w'].T + params['fc_b']          # [B*D, 1]
    att = jax.nn.sigmoid(jax.nn.sigmoid(logit))
    att = att.reshape(B, D).astype(f32)                         # att[b, d]

    # ---- fold conv bias + BatchNorm (inference) into weights / bias ----
    def fold(w, bias, bn):
        gamma, beta, mean, var = bn
        s = gamma / jnp.sqrt(var + BN_EPS)
        return w * s[:, None, None, None, None], (bias - mean) * s + beta

    w1f, t1 = fold(params['w1'], params['b1'], params['bn1'])
    w3f, t3 = fold(params['w3'], params['b3'], params['bn3'])
    w5f, t5 = fold(params['w5'], params['b5'], params['bn5'])

    # Fused per-tap weight [kd, kh, kw, 4C, C]: rows = conv1 | conv3 | conv5 | identity(residual).
    wc = jnp.zeros((5, 5, 5, 4 * C, C), f32)
    wc = wc.at[:, :, :, 2 * C:3 * C, :].set(jnp.transpose(w5f, (2, 3, 4, 0, 1)))
    wc = wc.at[1:4, 1:4, 1:4, C:2 * C, :].set(jnp.transpose(w3f, (2, 3, 4, 0, 1)))
    wc = wc.at[2, 2, 2, 0:C, :].set(w1f[:, :, 0, 0, 0])
    wc = wc.at[2, 2, 2, 3 * C:4 * C, :].set(jnp.eye(C, dtype=f32))
    # -> [5, 4C, 25*C], column order (tap, c_in) matching the in-kernel window concat.
    wc = wc.reshape(5, 25, 4 * C, C).transpose(0, 2, 1, 3).reshape(5, 4 * C, 25 * C)
    wc = wc.astype(jnp.bfloat16)

    t_comb = jnp.concatenate([t1, t3, t5, jnp.zeros((C,), f32)]).reshape(4 * C, 1)

    # ---- padded, channels-first, lane-flattened input slab (bf16) ----
    xp = jnp.pad(x, ((0, 0), (0, 0), (2, 2), (2, 2), (2, 2)))             # [B, C, DP, HP, WP]
    xp = jnp.transpose(xp, (0, 2, 1, 3, 4)).reshape(B, DP, C, LP)         # positions on lanes
    xp = jnp.pad(xp, ((0, 0), (0, 0), (0, 0), (S, S)))                    # halo for flat shifts
    xp = xp.astype(jnp.bfloat16)                                          # [B, DP, C, LP2]

    # ---- VMEM budget: stay well under v7x's 64 MiB / TensorCore ----
    if vmem_limit_bytes is None:
        try:
            cap = pltpu.get_tpu_info().vmem_capacity_bytes
        except Exception:
            cap = 64 * 1024 * 1024
        vmem_limit_bytes = int(min(48 * 1024 * 1024, (3 * cap) // 4))

    kernel = _make_sta_kernel(C, WP, LP, S)

    out_pad = pl.pallas_call(
        kernel,
        out_shape=jax.ShapeDtypeStruct((B, D, C, LP), f32),
        grid=(B, D, 5),
        in_specs=[
            pl.BlockSpec(memory_space=pltpu.MemorySpace.SMEM),                     # att [B, D]
            pl.BlockSpec((1, 1, C, LP2), lambda b, d, kd: (b, d + kd, 0, 0)),      # padded slice
            pl.BlockSpec((5, 4 * C, 25 * C), lambda b, d, kd: (0, 0, 0)),          # resident weights
            pl.BlockSpec((4 * C, 1), lambda b, d, kd: (0, 0)),                     # fused bias
        ],
        out_specs=pl.BlockSpec((1, 1, C, LP), lambda b, d, kd: (b, d, 0, 0)),
        scratch_shapes=[pltpu.VMEM((4 * C, LP), jnp.float32)],
        compiler_params=pltpu.CompilerParams(
            dimension_semantics=("parallel", "parallel", "arbitrary"),
            vmem_limit_bytes=vmem_limit_bytes),
    )(att, xp, wc, t_comb)

    # drop the spatial padding ring and return to PyTorch NCDHW layout
    out = out_pad.reshape(B, D, C, HP, WP)[:, :, :, 2:2 + H, 2:2 + W]
    return jnp.transpose(out, (0, 2, 1, 3, 4))


# ------------------------- pure-JAX reference -------------------------

def sta_reference(x, params):
    B, C, D, H, W = x.shape
    pooled = jnp.mean(x, axis=(3, 4))                           # [B, C, D]
    viewed = pooled.reshape(-1, C)                              # torch .view(-1, C)
    logit = viewed @ params['fc_w'].T + params['fc_b']
    a = jax.nn.sigmoid(jax.nn.sigmoid(logit))
    a5 = a.reshape(B, 1, D, 1, 1)

    def conv_bn_relu(w, b, bn, pad):
        gamma, beta, mean, var = bn
        z = jax.lax.conv_general_dilated(
            x, w, window_strides=(1, 1, 1), padding=[(pad, pad)] * 3,
            dimension_numbers=('NCDHW', 'OIDHW', 'NCDHW'),
            precision=jax.lax.Precision.HIGHEST)
        z = z + b.reshape(1, -1, 1, 1, 1)
        s = (gamma / jnp.sqrt(var + BN_EPS)).reshape(1, -1, 1, 1, 1)
        z = (z - mean.reshape(1, -1, 1, 1, 1)) * s + beta.reshape(1, -1, 1, 1, 1)
        return jnp.maximum(z, 0.0)

    y1 = conv_bn_relu(params['w1'], params['b1'], params['bn1'], 0)
    y3 = conv_bn_relu(params['w3'], params['b3'], params['bn3'], 1)
    y5 = conv_bn_relu(params['w5'], params['b5'], params['bn5'], 2)
    msa = y1 + y3 + y5
    return a5 * msa + x


# ------------------------- params + main -------------------------

def init_params(key, C):
    ks = jax.random.split(key, 20)
    n = lambda k, shape, s=0.1: s * jax.random.normal(k, shape, dtype=jnp.float32)
    bn = lambda kw, kb, km, kv: (1.0 + n(kw, (C,)), n(kb, (C,)),
                                 n(km, (C,)), 0.5 + jnp.abs(n(kv, (C,))))
    return {
        'w1': n(ks[0], (C, C, 1, 1, 1)), 'b1': n(ks[1], (C,)),
        'w3': n(ks[2], (C, C, 3, 3, 3)), 'b3': n(ks[3], (C,)),
        'w5': n(ks[4], (C, C, 5, 5, 5)), 'b5': n(ks[5], (C,)),
        'bn1': bn(ks[6], ks[7], ks[8], ks[9]),
        'bn3': bn(ks[10], ks[11], ks[12], ks[13]),
        'bn5': bn(ks[14], ks[15], ks[16], ks[17]),
        'fc_w': n(ks[18], (1, C)), 'fc_b': n(ks[19], (1,)),
    }


if __name__ == "__main__":
    key = jax.random.PRNGKey(0)
    kx, kp = jax.random.split(key)

    B, C, D, H, W = 2, 4, 8, 8, 8        # out_channels == in_channels (required by the residual add)
    x = jax.random.normal(kx, (B, C, D, H, W), dtype=jnp.float32)
    params = init_params(kp, C)

    out = jax.jit(sta_forward)(x, params)
    out = jax.block_until_ready(out)

    ref = sta_reference(x, params)
    assert out.shape == ref.shape == (B, C, D, H, W)
    max_err = float(jnp.max(jnp.abs(out - ref)))
    # bf16 activations/weights with f32 accumulation -> modest tolerance vs f32 reference
    if not jnp.allclose(out, ref, atol=5e-2, rtol=5e-2):
        raise AssertionError(f"Pallas STA mismatch vs reference, max abs err = {max_err}")

    print("KERNEL_OK")
</pallas_src>

<mosaic_0001>
module attributes {stable_mosaic.version = 11 : i64} {
  func.func @kernel(%arg0: i32, %arg1: i32, %arg2: i32, %arg3: memref<2x8xf32, #tpu.memory_space<smem>>, %arg4: memref<1x1x4x196xbf16, #tpu.memory_space<vmem>>, %arg5: memref<5x16x100xbf16, #tpu.memory_space<vmem>>, %arg6: memref<16x1xf32, #tpu.memory_space<vmem>>, %arg7: memref<1x1x4x144xf32, #tpu.memory_space<vmem>>, %arg8: memref<16x144xf32, #tpu.memory_space<vmem>>) attributes {dimension_semantics = [#tpu.dimension_semantics<parallel>, #tpu.dimension_semantics<parallel>, #tpu.dimension_semantics<arbitrary>], iteration_bounds = array<i64: 2, 8, 5>, scalar_prefetch = 0 : i64, scratch_operands = 1 : i64, tpu.core_type = #tpu.core_type<tc>, window_params = [{transform_indices = @transform_0, window_bounds = array<i64: 2, 8>}, {transform_indices = @transform_1, window_bounds = array<i64: 1, 1, 4, 196>}, {pipeline_mode = #tpu.pipeline_mode<synchronous>, transform_indices = @transform_2, window_bounds = array<i64: 5, 16, 100>}, {pipeline_mode = #tpu.pipeline_mode<synchronous>, transform_indices = @transform_3, window_bounds = array<i64: 16, 1>}, {transform_indices = @transform_4, window_bounds = array<i64: 1, 1, 4, 144>}]} {
    %c0_i32 = arith.constant 0 : i32
    %0 = arith.cmpi eq, %arg2, %c0_i32 : i32
    %1 = arith.extui %0 : i1 to i32
    %c0_i32_0 = arith.constant 0 : i32
    %2 = arith.cmpi ne, %1, %c0_i32_0 : i32
    scf.if %2 {
      %cst_11 = arith.constant 0.000000e+00 : f32
      %43 = vector.broadcast %cst_11 : f32 to vector<16x144xf32>
      %c0_12 = arith.constant 0 : index
      %c0_13 = arith.constant 0 : index
      %44 = vector.load %arg8[%c0_12, %c0_13] : memref<16x144xf32, #tpu.memory_space<vmem>>, vector<16x144xf32>
      tpu.vector_store %arg8[%c0_12, %c0_13], %43 {strides = array<i32>} : memref<16x144xf32, #tpu.memory_space<vmem>>, vector<16x144xf32>,
    } else {
    }
    %c0 = arith.constant 0 : index
    %c0_1 = arith.constant 0 : index
    %c0_2 = arith.constant 0 : index
    %c0_3 = arith.constant 0 : index
    %3 = vector.load %arg4[%c0, %c0_1, %c0_2, %c0_3] : memref<1x1x4x196xbf16, #tpu.memory_space<vmem>>, vector<1x1x4x196xbf16>
    %4 = vector.shape_cast %3 : vector<1x1x4x196xbf16> to vector<4x196xbf16>
    %5 = vector.extract_strided_slice %4 {offsets = [0, 0], sizes = [4, 144], strides = [1, 1]} : vector<4x196xbf16> to vector<4x144xbf16>
    %6 = vector.extract_strided_slice %4 {offsets = [0, 1], sizes = [4, 144], strides = [1, 1]} : vector<4x196xbf16> to vector<4x144xbf16>
    %7 = vector.extract_strided_slice %4 {offsets = [0, 2], sizes = [4, 144], strides = [1, 1]} : vector<4x196xbf16> to vector<4x144xbf16>
    %8 = vector.extract_strided_slice %4 {offsets = [0, 3], sizes = [4, 144], strides = [1, 1]} : vector<4x196xbf16> to vector<4x144xbf16>
    %9 = vector.extract_strided_slice %4 {offsets = [0, 4], sizes = [4, 144], strides = [1, 1]} : vector<4x196xbf16> to vector<4x144xbf16>
    %10 = vector.extract_strided_slice %4 {offsets = [0, 12], sizes = [4, 144], strides = [1, 1]} : vector<4x196xbf16> to vector<4x144xbf16>
    %11 = vector.extract_strided_slice %4 {offsets = [0, 13], sizes = [4, 144], strides = [1, 1]} : vector<4x196xbf16> to vector<4x144xbf16>
    %12 = vector.extract_strided_slice %4 {offsets = [0, 14], sizes = [4, 144], strides = [1, 1]} : vector<4x196xbf16> to vector<4x144xbf16>
    %13 = vector.extract_strided_slice %4 {offsets = [0, 15], sizes = [4, 144], strides = [1, 1]} : vector<4x196xbf16> to vector<4x144xbf16>
    %14 = vector.extract_strided_slice %4 {offsets = [0, 16], sizes = [4, 144], strides = [1, 1]} : vector<4x196xbf16> to vector<4x144xbf16>
    %15 = vector.extract_strided_slice %4 {offsets = [0, 24], sizes = [4, 144], strides = [1, 1]} : vector<4x196xbf16> to vector<4x144xbf16>
    %16 = vector.extract_strided_slice %4 {offsets = [0, 25], sizes = [4, 144], strides = [1, 1]} : vector<4x196xbf16> to vector<4x144xbf16>
    %17 = vector.extract_strided_slice %4 {offsets = [0, 26], sizes = [4, 144], strides = [1, 1]} : vector<4x196xbf16> to vector<4x144xbf16>
    %18 = vector.extract_strided_slice %4 {offsets = [0, 27], sizes = [4, 144], strides = [1, 1]} : vector<4x196xbf16> to vector<4x144xbf16>
    %19 = vector.extract_strided_slice %4 {offsets = [0, 28], sizes = [4, 144], strides = [1, 1]} : vector<4x196xbf16> to vector<4x144xbf16>
    %20 = vector.extract_strided_slice %4 {offsets = [0, 36], sizes = [4, 144], strides = [1, 1]} : vector<4x196xbf16> to vector<4x144xbf16>
    %21 = vector.extract_strided_slice %4 {offsets = [0, 37], sizes = [4, 144], strides = [1, 1]} : vector<4x196xbf16> to vector<4x144xbf16>
    %22 = vector.extract_strided_slice %4 {offsets = [0, 38], sizes = [4, 144], strides = [1, 1]} : vector<4x196xbf16> to vector<4x144xbf16>
    %23 = vector.extract_strided_slice %4 {offsets = [0, 39], sizes = [4, 144], strides = [1, 1]} : vector<4x196xbf16> to vector<4x144xbf16>
    %24 = vector.extract_strided_slice %4 {offsets = [0, 40], sizes = [4, 144], strides = [1, 1]} : vector<4x196xbf16> to vector<4x144xbf16>
    %25 = vector.extract_strided_slice %4 {offsets = [0, 48], sizes = [4, 144], strides = [1, 1]} : vector<4x196xbf16> to vector<4x144xbf16>
    %26 = vector.extract_strided_slice %4 {offsets = [0, 49], sizes = [4, 144], strides = [1, 1]} : vector<4x196xbf16> to vector<4x144xbf16>
    %27 = vector.extract_strided_slice %4 {offsets = [0, 50], sizes = [4, 144], strides = [1, 1]} : vector<4x196xbf16> to vector<4x144xbf16>
    %28 = vector.extract_strided_slice %4 {offsets = [0, 51], sizes = [4, 144], strides = [1, 1]} : vector<4x196xbf16> to vector<4x144xbf16>
    %29 = vector.extract_strided_slice %4 {offsets = [0, 52], sizes = [4, 144], strides = [1, 1]} : vector<4x196xbf16> to vector<4x144xbf16>
    %30 = tpu.concatenate %5, %6, %7, %8, %9, %10, %11, %12, %13, %14, %15, %16, %17, %18, %19, %20 in 0 : vector<4x144xbf16>, vector<4x144xbf16>, vector<4x144xbf16>, vector<4x144xbf16>, vector<4x144xbf16>, vector<4x144xbf16>, vector<4x144xbf16>, vector<4x144xbf16>, vector<4x144xbf16>, vector<4x144xbf16>, vector<4x144xbf16>, vector<4x144xbf16>, vector<4x144xbf16>, vector<4x144xbf16>, vector<4x144xbf16>, vector<4x144xbf16> -> vector<64x144xbf16>
    %31 = tpu.concatenate %21, %22, %23, %24, %25, %26, %27, %28, %29 in 0 : vector<4x144xbf16>, vector<4x144xbf16>, vector<4x144xbf16>, vector<4x144xbf16>, vector<4x144xbf16>, vector<4x144xbf16>, vector<4x144xbf16>, vector<4x144xbf16>, vector<4x144xbf16> -> vector<36x144xbf16>
    %32 = tpu.concatenate %30, %31 in 0 : vector<64x144xbf16>, vector<36x144xbf16> -> vector<100x144xbf16>
    %33 = arith.index_cast %arg2 : i32 to index
    %c0_4 = arith.constant 0 : index
    %c0_5 = arith.constant 0 : index
    %34 = vector.load %arg5[%33, %c0_4, %c0_5] : memref<5x16x100xbf16, #tpu.memory_space<vmem>>, vector<1x16x100xbf16>
    %35 = vector.shape_cast %34 : vector<1x16x100xbf16> to vector<16x100xbf16>
    %c0_6 = arith.constant 0 : index
    %c0_7 = arith.constant 0 : index
    %36 = vector.load %arg8[%c0_6, %c0_7] : memref<16x144xf32, #tpu.memory_space<vmem>>, vector<16x144xf32>
    %cst = arith.constant dense<0.000000e+00> : vector<16x144xf32>
    %37 = tpu.matmul %35, %32, %cst {dimension_numbers = #tpu.dot_dimension_numbers<[1], [0], [0], [1], [0, 0, 1, 1], [], []>} : vector<16x100xbf16>, vector<100x144xbf16>, vector<16x144xf32> -> vector<16x144xf32>
    %38 = arith.addf %36, %37 : vector<16x144xf32>
    %c0_8 = arith.constant 0 : index
    %c0_9 = arith.constant 0 : index
    %39 = vector.load %arg8[%c0_8, %c0_9] : memref<16x144xf32, #tpu.memory_space<vmem>>, vector<16x144xf32>
    tpu.vector_store %arg8[%c0_8, %c0_9], %38 {strides = array<i32>} : memref<16x144xf32, #tpu.memory_space<vmem>>, vector<16x144xf32>,
    %c4_i32 = arith.constant 4 : i32
    %40 = arith.cmpi eq, %arg2, %c4_i32 : i32
    %41 = arith.extui %40 : i1 to i32
    %c0_i32_10 = arith.constant 0 : i32
    %42 = arith.cmpi ne, %41, %c0_i32_10 : i32
    scf.if %42 {
      %c0_11 = arith.constant 0 : index
      %c0_12 = arith.constant 0 : index
      %43 = vector.load %arg8[%c0_11, %c0_12] : memref<16x144xf32, #tpu.memory_space<vmem>>, vector<16x144xf32>
      %44 = vector.extract_strided_slice %43 {offsets = [0, 0], sizes = [12, 144], strides = [1, 1]} : vector<16x144xf32> to vector<12x144xf32>
      %c0_13 = arith.constant 0 : index
      %c0_14 = arith.constant 0 : index
      %45 = vector.load %arg6[%c0_13, %c0_14] : memref<16x1xf32, #tpu.memory_space<vmem>>, vector<12x1xf32>
      %46 = vector.broadcast %45 : vector<12x1xf32> to vector<12x144xf32>
      %47 = arith.addf %44, %46 : vector<12x144xf32>
      %cst_15 = arith.constant 0.000000e+00 : f32
      %48 = vector.broadcast %cst_15 : f32 to vector<12x144xf32>
      %49 = arith.maximumf %47, %48 : vector<12x144xf32>
      %50 = vector.extract_strided_slice %49 {offsets = [0, 0], sizes = [4, 144], strides = [1, 1]} : vector<12x144xf32> to vector<4x144xf32>
      %51 = vector.extract_strided_slice %49 {offsets = [4, 0], sizes = [4, 144], strides = [1, 1]} : vector<12x144xf32> to vector<4x144xf32>
      %52 = arith.addf %50, %51 : vector<4x144xf32>
      %53 = vector.extract_strided_slice %49 {offsets = [8, 0], sizes = [4, 144], strides = [1, 1]} : vector<12x144xf32> to vector<4x144xf32>
      %54 = arith.addf %52, %53 : vector<4x144xf32>
      %55 = arith.index_cast %arg0 : i32 to index
      %56 = arith.index_cast %arg1 : i32 to index
      %57 = memref.load %arg3[%55, %56] : memref<2x8xf32, #tpu.memory_space<smem>>
      %58 = vector.broadcast %57 : f32 to vector<4x144xf32>
      %59 = arith.mulf %58, %54 : vector<4x144xf32>
      %60 = vector.extract_strided_slice %43 {offsets = [12, 0], sizes = [4, 144], strides = [1, 1]} : vector<16x144xf32> to vector<4x144xf32>
      %61 = arith.addf %59, %60 : vector<4x144xf32>
      %c0_16 = arith.constant 0 : index
      %c0_17 = arith.constant 0 : index
      %c0_18 = arith.constant 0 : index
      %c0_19 = arith.constant 0 : index
      %62 = vector.load %arg7[%c0_16, %c0_17, %c0_18, %c0_19] : memref<1x1x4x144xf32, #tpu.memory_space<vmem>>, vector<1x1x4x144xf32>
      %63 = vector.shape_cast %62 : vector<1x1x4x144xf32> to vector<4x144xf32>
      %64 = vector.shape_cast %61 : vector<4x144xf32> to vector<1x1x4x144xf32>
      tpu.vector_store %arg7[%c0_16, %c0_17, %c0_18, %c0_19], %64 {strides = array<i32>} : memref<1x1x4x144xf32, #tpu.memory_space<vmem>>, vector<1x1x4x144xf32>,
    } else {
    }
    return
  }
  func.func @transform_0(%arg0: i32, %arg1: i32, %arg2: i32) -> (i32, i32) {
    %c0_i32 = arith.constant 0 : i32
    %c0_i32_0 = arith.constant 0 : i32
    %c0_i32_1 = arith.constant 0 : i32
    return %c0_i32, %c0_i32_0 : i32, i32
  }
  func.func @transform_1(%arg0: i32, %arg1: i32, %arg2: i32) -> (i32, i32, i32, i32) {
    %0 = arith.addi %arg1, %arg2 : i32
    %c0_i32 = arith.constant 0 : i32
    %c0_i32_0 = arith.constant 0 : i32
    %c0_i32_1 = arith.constant 0 : i32
    return %arg0, %0, %c0_i32, %c0_i32_0 : i32, i32, i32, i32
  }
  func.func @transform_2(%arg0: i32, %arg1: i32, %arg2: i32) -> (i32, i32, i32) {
    %c0_i32 = arith.constant 0 : i32
    %c0_i32_0 = arith.constant 0 : i32
    %c0_i32_1 = arith.constant 0 : i32
    %c0_i32_2 = arith.constant 0 : i32
    return %c0_i32, %c0_i32_0, %c0_i32_1 : i32, i32, i32
  }
  func.func @transform_3(%arg0: i32, %arg1: i32, %arg2: i32) -> (i32, i32) {
    %c0_i32 = arith.constant 0 : i32
    %c0_i32_0 = arith.constant 0 : i32
    %c0_i32_1 = arith.constant 0 : i32
    return %c0_i32, %c0_i32_0 : i32, i32
  }
  func.func @transform_4(%arg0: i32, %arg1: i32, %arg2: i32) -> (i32, i32, i32, i32) {
    %c0_i32 = arith.constant 0 : i32
    %c0_i32_0 = arith.constant 0 : i32
    %c0_i32_1 = arith.constant 0 : i32
    return %arg0, %arg1, %c0_i32, %c0_i32_0 : i32, i32, i32, i32
  }
}

</mosaic_0001>

<bundles_post_ra>
// kernel: sta_forward.1
= control target key start
LH: loop header
LB: loop body
LE: loop exit
PB: predicated region body
PF: predicated region fallthrough
CT: control target
= control target key end

     0   :  { %s1161_s0 = inlined_call_operand.vmem [shape: f32[2,8], index: 0, kind: input, shape index: {}]   ;;  %s1162_s1 = inlined_call_operand.vmem [shape: bf16[2,12,4,196], index: 1, kind: input, shape index: {}]   ;;  %s1163_s2 = inlined_call_operand.vmem [shape: bf16[5,16,100], index: 2, kind: input, shape index: {}]   ;;  %s1164_s3 = inlined_call_operand.vmem [shape: f32[16,1], index: 3, kind: input, shape index: {}]   ;;  %s1165_s4 = inlined_call_operand.vmem [shape: f32[2,8,4,144], index: 4, kind: output, shape index: {}]  }
   0x1   :  { %1166 = sst [smem:[#allocation6_spill]] %s1161_s0 }
   0x2   :  { %9 = vsyncpa [#allocation4], 0  ;;  %s981_s15 = smov 0   ;;  %s983_s16 = smov 0  }
   0x3   :  { %s985_s17 = smov 0   ;;  %s987_s18 = smov 0  }
   0x4   :  { %s989_s19 = smov 0   ;;  %s991_s20 = smov 0  }
   0x5   :  { %s993_s21 = smov 0  }
   0x6 LB: > { %s744_s22 = sadd.s32 4294967295, %s932_s21   ;;  %s27_s23 = sadd.s32 1, %s920_s18  ;;  %s932_s21 = sphi %s993_s21, %s15_s21   ;;  %s928_s20 = sphi %s991_s20, %s1175_s20   ;;  %s924_s19 = sphi %s989_s19, %s1174_s19   ;;  %s920_s18 = sphi %s987_s18, %s1173_s18   ;;  %s916_s17 = sphi %s985_s17, %s1172_s17   ;;  %s912_s16 = sphi %s983_s16, %s1171_s16   ;;  %s908_s15 = sphi %s981_s15, %s1170_s15  }
   0x7   : > { %p28_p0 = scmp.ge.s32.totalorder %s27_s23, 5  ;;  %s30_s24 = sadd.s32 1, %s924_s19 }
   0x8   : > { %s34_s25 = sadd.s32 1, %s928_s20  ;;  %p746_p1 = scmp.ge.s32.totalorder %s932_s21, 1 }
   0x9   : > { %s1177_s23 = smov (%p28_p0, %s27_s23), 0  ;;  %s1179_s24 = smov (!%p28_p0, %s30_s24), %s924_s19 }
   0xa   : > { %p160_p2 = scmp.lt.s32.totalorder %s932_s21, 81  ;;  %p32_p3 = scmp.ge.s32.totalorder %s1179_s24, 8 }
   0xb   : > { %p1025_p4 = scmp.eq.s32.totalorder %s744_s22, 0  ;;  %s1169_s0 = sld [smem:[#allocation6_spill]] }
   0xc   : > { %p1029_p5 = pnand %p746_p1, %p160_p2  ;;  %s1181_s24 = smov (%p32_p3, %s1179_s24), 0 }
   0xd   : > { %s1183_s25 = smov (!%p32_p3, %s34_s25), %s928_s20 }
   0xe   : > { %p772_p6 = pneg %p1029_p5  ;;  %p36_p7 = scmp.ge.s32.totalorder %s1183_s25, 2 }
  0x10   : > { %p773_p8 = pnand %p1025_p4, %p772_p6  ;;  %s1185_s25 = smov (%p36_p7, %s1183_s25), 0 }
  0x11   : > { %s173_s30 = sshll.u32 %s1169_s0, 4  ;;  %s174_s30 = int_to_ptr.vmem [resolvable:$true] %s173_s30 }
  0x12   : > { %s859_s5 = scalar_lea.vmem %s174_s30, 32  ;;  %p861_p10 = pneg %p773_p8 }
  0x13   : > { %p860_p9 = scmp.ne.s32.totalorder %s174_s30, %s859_s5  ;;  %p867_p13 = scmp.lt.s32.totalorder %s174_s30, %s174_s30 }
  0x14   : > { %p868_p0 = scmp.lt.s32.totalorder %s859_s5, %s859_s5 }
  0x15   : > { %p862_p11 = pnand %p861_p10, %p860_p9 }
  0x16   : > { %p869_p1 = por %p868_p0, %p867_p13 }
  0x17   : > { %p863_p12 = pneg %p862_p11 }
  0x19   : > { %p870_p2 = pnand %p869_p1, %p863_p12 }
  0x1b   : > { %873 = shalt.err (!%p870_p2)
}
  0x1c   : > { %s934_s6 = smov [#allocation3]   ;;  %206 = sbr.rel (%p1029_p5) target bundleno = 567 (0x237), region = 36 }
  0x1d   : > { %775 = dma.vmem_to_smem (!%p773_p8), %s174_s30, 32, %s934_s6, [#allocation4]  }
  0x23   : > { %903 = dma.done.wait (%p1025_p4), [#allocation4], 32  }
  0x24   : > { %905 = vsyncadd (%p1025_p4), [#allocation4], 4294967264 }
  0x25   : > { %212 = sfence }
  0x26   : > { %s242_s7 = sadd.s32 %s908_s15, %s912_s16  ;;  %p243_p3 = scmp.lt.s32.totalorder %s916_s17, 1 }
  0x27   : > { %p245_p6 = scmp.lt.s32.totalorder %s242_s7, 11  ;;  %p255_p5 = scmp.lt.s32.totalorder %s912_s16, 7 }
  0x28   : > { %s244_s8 = scalar_select %p243_p3, %s916_s17, 1 }
  0x29   : > { %s1187_s7 = smov (!%p245_p6, %s242_s7), 11  ;;  %p756_p4 = scmp.ne.s32.totalorder %s908_s15, 0 }
  0x2a   : > { %s767_s9 = smul.u32 24, %s244_s8  ;;  %s751_s10 = sshll.u32 %s1187_s7, 1  ;;  %vm268_vm0 = vcmask (!%p756_p4), 130048   ;;  %v935_v0 = vmov (!%p756_p4), 0.0  }
  0x2b   : > { %s754_s26 = sshll.u32 %s244_s8, 4  ;;  %267 = vst [vmem:[#allocation2] sm:$0xff] (!%p756_p4), %v935_v0  ;;  %270 = vst [vmem:[#allocation2 + $0x10] sm:$0xff] (!%p756_p4), %v935_v0 }
  0x2c   : > { %s249_s11 = sadd.s32 %s767_s9, %s751_s10  ;;  %269 = vst.msk [vmem:[#allocation2 + $0x8] sm:$0xff] (!%p756_p4), %vm268_vm0, %v935_v0  ;;  %271 = vst.msk [vmem:[#allocation2 + $0x18] sm:$0xff] (!%p756_p4), %vm268_vm0, %v935_v0 }
  0x2d   : > { %s752_s12 = sshll.u32 %s249_s11, 1 }
  0x2e   : > { %s251_s22 = scalar_lea.vmem %s1162_s1, %s752_s12  ;;  %266 = sbr.rel (%p756_p4) target bundleno = 53 (0x35), region = 44 }
  0x2f   : > { %s256_s27 = scalar_select %p255_p5, %s912_s16, 7 }
  0x31   : > { %s753_s28 = sshll.u32 %s256_s27, 1 }
  0x32   : > { %s259_s29 = sadd.s32 %s754_s26, %s753_s28 }
  0x33   : > { %s755_s30 = sshll.u32 %s259_s29, 2 }
  0x34   : > { %s1063_s0 = scalar_lea.vmem %s1165_s4, %s755_s30 }
  0x35 PF: > { %v272_v1 = vld [vmem:[%s251_s22] sm:$0xf]  ;;  %v277_v2 = vlaneseq  ;;  %v936_v3 = vmov 1983009808   ;;  %s937_s7 = smov 127   ;;  %s938_s8 = smov 126  }
  0x36   : > { %v275_v4 = vunpack.c.l.s4 %v936_v3  ;;  %v282_v7 = vcombine.low %v272_v1, %v272_v1  ;;  %s939_s9 = smov 125   ;;  %s940_s10 = smov 116   ;;  %vm383_vm1 = vcmask 1041408   ;;  %vm295_vm2 = vcmask 1039360  }
  0x37   : > { %v278_v5 = vshrl.u32 %v277_v2, 7  ;;  %s941_s11 = smov 117   ;;  %s942_s12 = smov 115   ;;  %vm390_vm3 = vcmask 1043456   ;;  %vm395_vm4 = vcmask 1045504   ;;  %vm309_vm5 = vcmask 1022976  }
  0x38   : > { %v276_v6 = vunpack.c.0.s8 %v275_v4  ;;  %s943_s13 = smov 114   ;;  %s944_s14 = smov 113   ;;  %vm302_vm6 = vcmask 1031168   ;;  %vm454_vm7 = vcmask 957440   ;;  %vm327_vm8 = vcmask 941056  }
  0x39   : > { %s945_s22 = smov 124   ;;  %s946_s26 = smov 112   ;;  %vm321_vm9 = vcmask 949248   ;;  %v954_v37 = vmov 0   ;;  %vm333_vm10 = vcmask 932864   ;;  %vm339_vm11 = vcmask 924672  }
  0x3a   : > { %v279_v8 = vsub.s32 %v276_v6, %v278_v5  ;;  %s947_s27 = smov 104   ;;  %s948_s28 = smov 103   ;;  %544 = vmatprep.mubr.bf16.mxu0 %v954_v37  ;;  %vm315_vm12 = vcmask 1014784   ;;  %vm345_vm13 = vcmask 916480   ;;  %vm351_vm14 = vcmask 850944  }
  0x3b   : > { %s949_s29 = smov 102   ;;  %s950_s30 = smov 101   ;;  %vm357_vm15 = vcmask 842752   ;;  %vm363_vm0 = vcmask 834560  }
  0x3c   : > { %v289_v9 = vrot.slane %v282_v7, %v279_v8  ;;  %v1066_v10 = vrot.slane %v272_v1, %v279_v8  ;;  %s951_s5 = smov 100   ;;  %s952_s6 = smov 92  }
  0x3d   : > { %p762_p7 = scmp.ne.s32.totalorder %s908_s15, 4 }
  0x3e   : > { %291 = vrot.lane.b32.xlu0 %v289_v9, %s937_s7  ;;  %300 = vrot.lane.b32.xlu1 %v1066_v10, %s938_s8  ;;  %v290_v11 = vcombine.high %v289_v9, %v289_v9  ;;  %v304_v12 = vcombine.low %v289_v9, %v289_v9  ;;  %v297_v13 = vcombine.low %v1066_v10, %v1066_v10 }
  0x3f   : > { %v281_v14 = vcombine.high %v1066_v10, %v1066_v10 }
  0x42   : > { %293 = vrot.lane.b32.xlu0 %v290_v11, %s937_s7  ;;  %307 = vrot.lane.b32.xlu1 %v289_v9, %s939_s9  ;;  %s953_s7 = smov 91  }
  0x46   : > { %305 = vrot.lane.b32.xlu0 %v304_v12, %s939_s9  ;;  %298 = vrot.lane.b32.xlu1 %v297_v13, %s938_s8  ;;  %s766_s8 = sshll.u32 %s908_s15, 3  ;;  %s607_s15 = sand.u32 (!%p762_p7), 127, %s912_s16 }
  0x4a   : > { %317 = vrot.lane.b32.xlu0 %v289_v9, %s940_s10  ;;  %319 = vrot.lane.b32.xlu1 %v290_v11, %s940_s10 }
  0x4e   : > { %450 = vrot.lane.b32.xlu0 %v1066_v10, %s941_s11  ;;  %452 = vrot.lane.b32.xlu1 %v281_v14, %s941_s11  ;;  %s1093_s11 = scalar_lea.vmem %s1163_s2, %s766_s8 }
  0x52   : > { %323 = vrot.lane.b32.xlu0 %v297_v13, %s942_s12  ;;  %325 = vrot.lane.b32.xlu1 %v1066_v10, %s942_s12 }
  0x56   : > { %329 = vrot.lane.b32.xlu0 %v304_v12, %s943_s13  ;;  %331 = vrot.lane.b32.xlu1 %v289_v9, %s943_s13 }
  0x5a   : > { %335 = vrot.lane.b32.xlu0 %v1066_v10, %s944_s14  ;;  %337 = vrot.lane.b32.xlu1 %v281_v14, %s944_s14 }
  0x5e   : > { %311 = vrot.lane.b32.xlu0 %v1066_v10, %s945_s22  ;;  %313 = vrot.lane.b32.xlu1 %v281_v14, %s945_s22 }
  0x62   : > { %341 = vrot.lane.b32.xlu0 %v289_v9, %s946_s26  ;;  %343 = vrot.lane.b32.xlu1 %v290_v11, %s946_s26  ;;  %s602_s26 = sshra.s32 (!%p762_p7), %s912_s16, 7 }
  0x66   : > { %347 = vrot.lane.b32.xlu0 %v297_v13, %s947_s27  ;;  %349 = vrot.lane.b32.xlu1 %v1066_v10, %s947_s27  ;;  %s604_s27 = sadd.s32 (!%p762_p7), %s916_s17, %s602_s26 }
  0x6a   : > { %353 = vrot.lane.b32.xlu0 %v304_v12, %s948_s28  ;;  %355 = vrot.lane.b32.xlu1 %v289_v9, %s948_s28  ;;  %s763_s28 = sshll.u32 (!%p762_p7), %s604_s27, 7 }
  0x6e   : > { %361 = vrot.lane.b32.xlu1 %v281_v14, %s949_s29  ;;  %359 = vrot.lane.b32.xlu0 %v1066_v10, %s949_s29  ;;  %s608_s29 = sadd.s32 (!%p762_p7), %s763_s28, %s607_s15 }
  0x72   : > { %367 = vrot.lane.b32.xlu1 %v290_v11, %s950_s30  ;;  %365 = vrot.lane.b32.xlu0 %v289_v9, %s950_s30  ;;  %s609_s30 = sld [smem:[#allocation3 + %s608_s29]] (!%p762_p7) }
  0x76   : > { %373 = vrot.lane.b32.xlu1 %v1066_v10, %s951_s5  ;;  %371 = vrot.lane.b32.xlu0 %v297_v13, %s951_s5 }
  0x7a   : > { %379 = vrot.lane.b32.xlu1 %v289_v9, %s952_s6  ;;  %377 = vrot.lane.b32.xlu0 %v304_v12, %s952_s6 }
  0xb0   : > { %v292_v15 = vpop.permute.xlu0 %291  ;;  %v301_v16 = vpop.permute.xlu1 %300 }
  0xb4   : > { %v294_v17 = vpop.permute.xlu0 %293  ;;  %v308_v18 = vpop.permute.xlu1 %307 }
  0xb5   : > { %v389_v19 = vsel %vm383_vm1, %v281_v14, %v294_v17  ;;  %v296_v20 = vsel %vm295_vm2, %v292_v15, %v294_v17  ;;  %vm369_vm2 = vcmask 826368  }
  0xb6   : > { %v394_v21 = vsel %vm390_vm3, %v389_v19, %v301_v16  ;;  %v386_v25 = vsel %vm383_vm1, %v1066_v10, %v296_v20 }
  0xb7   : > { %v400_v22 = vsel %vm395_vm4, %v394_v21, %v308_v18 }
  0xb8   : > { %v306_v23 = vpop.permute.xlu0 %305  ;;  %v299_v24 = vpop.permute.xlu1 %298  ;;  %470 = vrot.lane.b32.xlu1 %v400_v22, %s953_s7  ;;  %512 = vmatprep.subr.bf16.mxu0 %v400_v22 }
  0xb9   : > { %v310_v26 = vsel %vm309_vm5, %v306_v23, %v308_v18  ;;  %v303_v27 = vsel %vm302_vm6, %v299_v24, %v301_v16  ;;  %vm375_vm5 = vcmask 818176   ;;  %vm381_vm6 = vcmask 752640  }
  0xba   : > { %v392_v28 = vsel %vm390_vm3, %v386_v25, %v303_v27 }
  0xbb   : > { %v397_v29 = vsel %vm395_vm4, %v392_v28, %v310_v26 }
  0xbc   : > { %v318_v30 = vpop.permute.xlu0 %317  ;;  %468 = vrot.lane.b32.xlu0 %v397_v29, %s953_s7  ;;  %v320_v31 = vpop.permute.xlu1 %319  ;;  %513 = vmatpush1.bf16.msra.mxu0 %v397_v29 }
  0xbd   : > { %v322_v39 = vsel %vm321_vm9, %v318_v30, %v320_v31 }
  0xc0   : > { %v451_v32 = vpop.permute.xlu0 %450  ;;  %v453_v33 = vpop.permute.xlu1 %452 }
  0xc1   : > { %v455_v36 = vsel %vm454_vm7, %v451_v32, %v453_v33  ;;  %v459_v40 = vsel %vm383_vm1, %v453_v33, %v320_v31  ;;  %vm480_vm7 = vcmask 744448  }
  0xc2   : > { %v457_v41 = vsel %vm383_vm1, %v455_v36, %v322_v39 }
  0xc4   : > { %v324_v34 = vpop.permute.xlu0 %323  ;;  %v326_v35 = vpop.permute.xlu1 %325 }
  0xc5   : > { %v328_v38 = vsel %vm327_vm8, %v324_v34, %v326_v35  ;;  %v461_v42 = vsel %vm390_vm3, %v459_v40, %v326_v35  ;;  %v857_v40 = vld [vmem:[%s1093_s11] sm:$0xff]  }
  0xc6   : > { %v460_v47 = vsel %vm390_vm3, %v457_v41, %v328_v38  ;;  %v493_v41 = vld [vmem:[#allocation2] sm:$0xff] }
  0xc8   : > { %v330_v43 = vpop.permute.xlu0 %329  ;;  %v332_v44 = vpop.permute.xlu1 %331 }
  0xc9   : > { %v334_v45 = vsel %vm333_vm10, %v330_v43, %v332_v44  ;;  %v463_v46 = vsel %vm395_vm4, %v461_v42, %v332_v44  ;;  %v494_v42 = vld [vmem:[#allocation2 + $0x8] sm:$0xff] }
  0xca   : > { %474 = vrot.lane.b32.xlu1 %v463_v46, %s953_s7  ;;  %v462_v48 = vsel %vm395_vm4, %v460_v47, %v334_v45  ;;  %v496_v47 = vld [vmem:[#allocation2 + $0x18] sm:$0xff] }
  0xcb   : > { %472 = vrot.lane.b32.xlu0 %v462_v48, %s953_s7 }
  0xcc   : > { %v336_v49 = vpop.permute.xlu0 %335  ;;  %v338_v50 = vpop.permute.xlu1 %337 }
  0xcd   : > { %v340_v51 = vsel %vm339_vm11, %v336_v49, %v338_v50 }
  0xce   : > { %478 = vrot.lane.b32.xlu1 %v338_v50, %s953_s7 }
  0xcf   : > { %476 = vrot.lane.b32.xlu0 %v340_v51, %s953_s7 }
  0xd0   : > { %v312_v52 = vpop.permute.xlu0 %311  ;;  %v314_v53 = vpop.permute.xlu1 %313 }
  0xd1   : > { %v316_v54 = vsel %vm315_vm12, %v312_v52, %v314_v53  ;;  %v407_v55 = vsel %vm383_vm1, %v314_v53, %v320_v31  ;;  %v572_v53 = vld [vmem:[%s1164_s3] sm:$0xff] (!%p762_p7) }
  0xd2   : > { %v404_v56 = vsel %vm383_vm1, %v316_v54, %v322_v39  ;;  %v411_v57 = vsel %vm390_vm3, %v407_v55, %v326_v35  ;;  %v955_v54 = vmov (!%p762_p7), 0   ;;  %v573_v55 = vld [vmem:[%s1164_s3 + $0x8] sm:$0xf] (!%p762_p7) }
  0xd3   : > { %v416_v58 = vsel %vm395_vm4, %v411_v57, %v332_v44  ;;  %v409_v59 = vsel %vm390_vm3, %v404_v56, %v328_v38  ;;  %v495_v44 = vld [vmem:[#allocation2 + $0x10] sm:$0xff]  ;;  %858 = vset.pattern.permute.xlu0 (!%p762_p7), %v955_v54 }
  0xd4   : > { %v342_v60 = vpop.permute.xlu0 %341  ;;  %v344_v61 = vpop.permute.xlu1 %343  ;;  %514 = vmatprep.subr.bf16.mxu0 %v416_v58  ;;  %v413_v62 = vsel %vm395_vm4, %v409_v59, %v334_v45  ;;  %576 = vperm.xlu0 (!%p762_p7), %858, %v572_v53  }
  0xd5   : > { %515 = vmatpush1.bf16.msra.mxu0 %v413_v62  ;;  %v346_v1 = vsel %vm345_vm13, %v342_v60, %v344_v61  ;;  %v423_v3 = vsel %vm383_vm1, %v338_v50, %v344_v61 }
  0xd6   : > { %v420_v4 = vsel %vm383_vm1, %v340_v51, %v346_v1 }
  0xd8   : > { %v348_v63 = vpop.permute.xlu0 %347  ;;  %v350_v0 = vpop.permute.xlu1 %349  ;;  %581 = vperm.xlu0 (!%p762_p7), %858, %v573_v55  }
  0xd9   : > { %v352_v2 = vsel %vm351_vm14, %v348_v63, %v350_v0  ;;  %v427_v5 = vsel %vm390_vm3, %v423_v3, %v350_v0 }
  0xda   : > { %v425_v10 = vsel %vm390_vm3, %v420_v4, %v352_v2 }
  0xdc   : > { %v354_v6 = vpop.permute.xlu0 %353  ;;  %v356_v7 = vpop.permute.xlu1 %355 }
  0xdd   : > { %v358_v8 = vsel %vm357_vm15, %v354_v6, %v356_v7  ;;  %v432_v9 = vsel %vm395_vm4, %v427_v5, %v356_v7 }
  0xde   : > { %516 = vmatprep.subr.bf16.mxu0 %v432_v9  ;;  %v429_v11 = vsel %vm395_vm4, %v425_v10, %v358_v8  ;;  %v610_v10 = vstv (!%p762_p7), %s609_s30 }
  0xdf   : > { %517 = vmatpush1.bf16.msra.mxu0 %v429_v11 }
  0xe0   : > { %v362_v12 = vpop.permute.xlu1 %361  ;;  %v360_v13 = vpop.permute.xlu0 %359 }
  0xe1   : > { %v364_v16 = vsel %vm363_vm0, %v360_v13, %v362_v12 }
  0xe4   : > { %v368_v14 = vpop.permute.xlu1 %367  ;;  %v366_v15 = vpop.permute.xlu0 %365 }
  0xe5   : > { %v370_v17 = vsel %vm369_vm2, %v366_v15, %v368_v14  ;;  %v439_v18 = vsel %vm383_vm1, %v362_v12, %v368_v14 }
  0xe6   : > { %v436_v19 = vsel %vm383_vm1, %v364_v16, %v370_v17 }
  0xe8   : > { %v374_v20 = vpop.permute.xlu1 %373  ;;  %v372_v21 = vpop.permute.xlu0 %371 }
  0xe9   : > { %v376_v22 = vsel %vm375_vm5, %v372_v21, %v374_v20  ;;  %v443_v23 = vsel %vm390_vm3, %v439_v18, %v374_v20 }
  0xea   : > { %v441_v24 = vsel %vm390_vm3, %v436_v19, %v376_v22 }
  0xec   : > { %v380_v25 = vpop.permute.xlu1 %379  ;;  %v378_v26 = vpop.permute.xlu0 %377 }
  0xed   : > { %v382_v27 = vsel %vm381_vm6, %v378_v26, %v380_v25  ;;  %v448_v28 = vsel %vm395_vm4, %v443_v23, %v380_v25 }
  0xee   : > { %518 = vmatprep.subr.bf16.mxu0 %v448_v28  ;;  %v445_v29 = vsel %vm395_vm4, %v441_v24, %v382_v27  ;;  %vm560_vm4 = vcmask 130048  }
  0xef   : > { %519 = vmatpush1.bf16.msra.mxu0 %v445_v29 }
 0x12a   : > { %v471_v30 = vpop.permute.xlu1 %470 }
 0x12b   : > { %520 = vmatprep.subr.bf16.mxu0 %v471_v30 }
 0x12e   : > { %v469_v31 = vpop.permute.xlu0 %468 }
 0x12f   : > { %v481_v32 = vsel %vm480_vm7, %v469_v31, %v471_v30 }
 0x130   : > { %521 = vmatpush1.bf16.msra.mxu0 %v481_v32 }
 0x13c   : > { %v475_v33 = vpop.permute.xlu1 %474 }
 0x13d   : > { %v473_v34 = vpop.permute.xlu0 %472  ;;  %522 = vmatprep.subr.bf16.mxu0 %v475_v33 }
 0x13e   : > { %v482_v35 = vsel %vm480_vm7, %v473_v34, %v475_v33 }
 0x13f   : > { %523 = vmatpush1.bf16.msra.mxu0 %v482_v35 }
 0x140   : > { %v479_v36 = vpop.permute.xlu1 %478 }
 0x141   : > { %v477_v37 = vpop.permute.xlu0 %476  ;;  %760 = vmatprep.subr.msk.bf16.mxu0 %vm383_vm1, %v479_v36 }
 0x142   : > { %v483_v38 = vsel %vm480_vm7, %v477_v37, %v479_v36 }
 0x143   : > { %v507_v39 = vsel %vm383_vm1, %v483_v38, 0  ;;  %vm625_vm1 = vcmask (!%p762_p7), 130052  }
 0x144   : > { %525 = vmatpush1.bf16.msra.mxu0 %v507_v39  ;;  %vm626_vm8 = vmor (!%p762_p7), %vm625_vm1, %vm390_vm3 }
 0x147   : > { %761 = vmatmul.mubr.msk.bf16.vlgmr.msra.gmra.mrb[0].mxu0 %vm375_vm5, %v857_v40 }
 0x153   : > { %v577_v58 = vpop.permute.xlu0 (!%p762_p7), %576 }
 0x157   : > { %v582_v1 = vpop.permute.xlu0 (!%p762_p7), %581 }
 0x21a   : > { %v546_v43 = vpop.f32.mrb[0].mxu0  ;;  %567 = sbr.rel (%p762_p7) target bundleno = 567 (0x237), region = 48 }
 0x21b   : > { %v555_v45 = vadd.f32 %v546_v43, %v493_v41  ;;  %v548_v46 = vpop.f32.mrb[1].mxu0 }
 0x21c   : > { %v556_v48 = vadd.f32 %v548_v46, %v494_v42  ;;  %v550_v49 = vpop.f32.mrb[2].mxu0 }
 0x21d   : > { %559 = vst [vmem:[#allocation2] sm:$0xff] %v555_v45  ;;  %v557_v50 = vadd.f32 %v550_v49, %v495_v44  ;;  %v552_v51 = vpop.f32.mrb[3].mxu0 }
 0x21e   : > { %561 = vst.msk [vmem:[#allocation2 + $0x8] sm:$0xff] %vm560_vm4, %v556_v48  ;;  %v558_v52 = vadd.f32 %v552_v51, %v496_v47 }
 0x21f   : > { %562 = vst [vmem:[#allocation2 + $0x10] sm:$0xff] %v557_v50 }
 0x220   : > { %563 = vst.msk [vmem:[#allocation2 + $0x18] sm:$0xff] %vm560_vm4, %v558_v52 }
 0x224   : > { %v568_v56 = vld [vmem:[#allocation2] sm:$0xff] }
 0x225   : > { %v569_v57 = vld [vmem:[#allocation2 + $0x8] sm:$0xff]  ;;  %v584_v59 = vadd.f32 %v577_v58, %v568_v56 }
 0x226   : > { %v585_v60 = vadd.f32 %v577_v58, %v569_v57  ;;  %v570_v61 = vld [vmem:[#allocation2 + $0x10] sm:$0xff] }
 0x227   : > { %v571_v62 = vld [vmem:[#allocation2 + $0x18] sm:$0xff]  ;;  %v588_v63 = vmax.f32 %v584_v59, 0.0  ;;  %v586_v4 = vadd.f32 %v582_v1, %v570_v61  ;;  %v615_v13 = vrot.slane %v570_v61, 4 }
 0x228   : > { %v589_v0 = vmax.f32 %v585_v60, 0.0  ;;  %v587_v5 = vadd.f32 %v582_v1, %v571_v62  ;;  %v616_v14 = vrot.slane %v571_v62, 4 }
 0x229   : > { %v594_v2 = vrot.slane %v588_v63, 4  ;;  %v590_v8 = vmax.f32 %v586_v4, 0.0 }
 0x22a   : > { %v595_v3 = vrot.slane %v589_v0, 4  ;;  %v591_v9 = vmax.f32 %v587_v5, 0.0 }
 0x22b   : > { %v598_v6 = vadd.f32 %v594_v2, %v588_v63 }
 0x22c   : > { %v599_v7 = vadd.f32 %v595_v3, %v589_v0 }
 0x22d   : > { %v600_v11 = vadd.f32 %v598_v6, %v590_v8 }
 0x22e   : > { %v601_v12 = vadd.f32 %v599_v7, %v591_v9 }
 0x22f   : > { %v611_v15 = vmul.f32 %v610_v10, %v600_v11 }
 0x230   : > { %v612_v16 = vmul.f32 %v610_v10, %v601_v12 }
 0x231   : > { %v619_v17 = vadd.f32 %v615_v13, %v611_v15 }
 0x232   : > { %v620_v18 = vadd.f32 %v616_v14, %v612_v16 }
 0x234   : > { %v623_v19 = vcombine.low %v619_v17, %v620_v18 }
 0x236   : > { %627 = vst.msk [vmem:[%s1063_s0] sm:$0xff] %vm626_vm8, %v623_v19 }
 0x237 PF: > { %s15_s21 = sadd.s32 1, %s932_s21   ;;  %s1170_s15 = smov %s920_s18 }
 0x238   : > { %p12_p8 = scmp.ge.s32.totalorder %s15_s21, 82   ;;  %s1171_s16 = smov %s924_s19 }
 0x239   : > { %s1172_s17 = smov %s928_s20  ;;  %s1173_s18 = smov %s1177_s23 }
 0x23a   : > { %s1174_s19 = smov %s1181_s24  ;;  %s1175_s20 = smov %s1185_s25 }
 0x23b   :  { %14 = sbr.rel (!%p12_p8) target bundleno = 6 (0x6), region = 80 }
 0x242   :  { %657 = vsyncpa [#allocation4], 1 }
 0x243   :  { %659 = vsyncpa [#allocation4 + $0x1], 1 }

</bundles_post_ra>
